<compile_context>
chip_gen: v6e
topology: v6e:2x2x1
jax: 0.10.0
libtpu: 0.0.40
codegen_flags: <defaults>
</compile_context>

<pallas_src>
import jax
import jax.numpy as jnp
from jax.experimental import pallas as pl
from jax.experimental.pallas import tpu as pltpu

_LANE = 128       # lane width of a vreg
_SUBLANE = 8      # sublane count of a vreg (f32)
_NEG_LARGE = -1e30  # value for padded logits (exp() underflows to 0)


def _round_up(x, m):
    return (x + m - 1) // m * m


def _cdiv(a, b):
    return -(-a // b)


def mlp_logsoftmax_kernel(x_ref, w1_ref, b1_ref, w2_ref, b2_ref, o_ref, acc_ref):
    k = pl.program_id(1)

    @pl.when(k == 0)
    def _init():
        # Second-linear bias broadcast over rows.  Padded output lanes carry
        # -1e30 here (and the padded w2 columns are 0), so they can never win
        # the max nor contribute to the logsumexp -- no in-kernel lane mask.
        acc_ref[...] = jnp.broadcast_to(b2_ref[...], acc_ref.shape)

    # First linear on this chunk of the hidden dim (bf16 operands, f32 accum).
    a = jnp.dot(x_ref[...], w1_ref[...], preferred_element_type=jnp.float32)
    a = a + b1_ref[...]
    # Second linear: accumulate this hidden-chunk's contribution in f32.
    acc_ref[...] += jnp.dot(a.astype(jnp.bfloat16), w2_ref[...],
                            preferred_element_type=jnp.float32)

    # TODO(synk): nn.Dropout(p=0.5) is identity in eval mode; training-mode
    # dropout would need pltpu.prng_seed / pltpu.prng_random_bits masking here.

    @pl.when(k == pl.num_programs(1) - 1)
    def _finalize():
        # Numerically stable LogSoftmax over the last dim, in f32.
        d = acc_ref[...]
        m = jnp.max(d, axis=-1, keepdims=True)
        s = d - m
        lse = jnp.log(jnp.sum(jnp.exp(s), axis=-1, keepdims=True))
        o_ref[...] = (s - lse).astype(o_ref.dtype)


def model_forward(x, w1, b1, w2, b2, *, block_b=256, block_k=1024):
    """x: [B, dim_in]; w1: [dim_in, dim_inter]; b1: [dim_inter];
    w2: [dim_inter, dim_out]; b2: [dim_out]."""
    B, dim_in = x.shape
    dim_inter = w1.shape[1]
    dim_out = w2.shape[1]

    # ---- tile sizes --------------------------------------------------------
    # Batch tile: multiple of 8 sublanes, capped at block_b.  Force >=2 grid
    # steps for B > 8 so the "parallel" batch axis can use both v7x TCs, and
    # rebalance so the last (ragged) block is not mostly padding.
    tb = min(block_b, _round_up(B, _SUBLANE))
    n_b = _cdiv(B, tb)
    if n_b == 1 and B > _SUBLANE:
        n_b = 2
    tb = min(_round_up(_cdiv(B, n_b), _SUBLANE), _round_up(B, _SUBLANE))
    n_b = _cdiv(B, tb)

    # Hidden (reduction) tile: multiple of 128 so the first matmul's N and the
    # second matmul's K are lane-aligned.  Zero-pad the hidden dim to a
    # multiple of tk (free: padded K contributes nothing).
    block_k = _round_up(block_k, _LANE)
    tk = min(block_k, _round_up(dim_inter, _LANE))
    k_pad = _round_up(dim_inter, tk)
    n_k = k_pad // tk

    # Lane-dense output: pad output features to a multiple of 128 so stores
    # are full `vst`s instead of masked partial stores.
    n_pad = _round_up(dim_out, _LANE)

    # ---- operand prep (weights padded once; matmul operands in bf16) -------
    x_bf = x.astype(jnp.bfloat16)      # no row-padding copy of x: the last
                                       # batch block is ragged and Pallas masks
                                       # its out-of-bounds rows on the store.
    w1_p = jnp.pad(w1, ((0, 0), (0, k_pad - dim_inter))).astype(jnp.bfloat16)
    b1_p = jnp.pad(b1.reshape(1, -1), ((0, 0), (0, k_pad - dim_inter)))
    w2_p = jnp.pad(w2, ((0, k_pad - dim_inter), (0, n_pad - dim_out))
                   ).astype(jnp.bfloat16)
    b2_p = jnp.pad(b2.reshape(1, -1), ((0, 0), (0, n_pad - dim_out)),
                   constant_values=_NEG_LARGE)

    # ---- VMEM budget (double-buffered tiles + single f32 accumulator) ------
    vmem_need = (
        2 * (tb * dim_in * 2          # x tile (bf16)
             + dim_in * tk * 2        # w1 block (bf16)
             + tk * 4                 # b1 block (f32)
             + tk * n_pad * 2         # w2 block (bf16)
             + n_pad * 4              # b2 block (f32)
             + tb * n_pad * 4)        # out tile (f32)
        + tb * n_pad * 4)             # accumulator scratch (f32)
    vmem_limit = int(min(max(2 * vmem_need, 32 << 20), 56 << 20))

    w_reps = n_b if n_k > 1 else 1    # weights re-streamed per batch tile iff k-tiled
    cost = pl.CostEstimate(
        flops=2 * B * (dim_in * k_pad + k_pad * n_pad) + 5 * B * n_pad,
        transcendentals=B * (n_pad + 1),
        bytes_accessed=(x_bf.size * 2 + B * n_pad * 4 + b2_p.size * 4
                        + w_reps * (w1_p.size * 2 + b1_p.size * 4 + w2_p.size * 2)),
    )

    out = pl.pallas_call(
        mlp_logsoftmax_kernel,
        out_shape=jax.ShapeDtypeStruct((B, n_pad), jnp.float32),
        grid=(n_b, n_k),
        in_specs=[
            pl.BlockSpec((tb, dim_in), lambda i, k: (i, 0)),   # x tile
            pl.BlockSpec((dim_in, tk), lambda i, k: (0, k)),   # w1 k-chunk
            pl.BlockSpec((1, tk), lambda i, k: (0, k)),        # b1 k-chunk
            pl.BlockSpec((tk, n_pad), lambda i, k: (k, 0)),    # w2 k-chunk
            pl.BlockSpec((1, n_pad), lambda i, k: (0, 0)),     # b2 (resident)
        ],
        out_specs=pl.BlockSpec((tb, n_pad), lambda i, k: (i, 0)),
        scratch_shapes=[pltpu.VMEM((tb, n_pad), jnp.float32)],
        compiler_params=pltpu.CompilerParams(
            dimension_semantics=("parallel", "arbitrary"),
            vmem_limit_bytes=vmem_limit,
        ),
        cost_estimate=cost,
    )(x_bf, w1_p, b1_p, w2_p, b2_p)

    # Drop the padded output lanes.
    return out[:, :dim_out]


if __name__ == "__main__":
    # Small shapes consistent with the module:
    # dim_in = player features, dim_inter = hidden, dim_out = positions.
    batch, dim_in, dim_inter, dim_out = 8, 32, 64, 16

    key = jax.random.PRNGKey(0)
    k_x, k_w1, k_b1, k_w2, k_b2 = jax.random.split(key, 5)

    x = jax.random.normal(k_x, (batch, dim_in), dtype=jnp.float32)

    # Deterministic parameter init (PyTorch-style uniform bounds).
    bound1 = 1.0 / jnp.sqrt(dim_in)
    w1 = jax.random.uniform(k_w1, (dim_in, dim_inter), jnp.float32, -bound1, bound1)
    b1 = jax.random.uniform(k_b1, (dim_inter,), jnp.float32, -bound1, bound1)
    bound2 = 1.0 / jnp.sqrt(dim_inter)
    w2 = jax.random.uniform(k_w2, (dim_inter, dim_out), jnp.float32, -bound2, bound2)
    b2 = jax.random.uniform(k_b2, (dim_out,), jnp.float32, -bound2, bound2)

    out = model_forward(x, w1, b1, w2, b2)
    jax.block_until_ready(out)

    # Sanity check against pure-JAX f32 reference (dropout identity in eval).
    # bf16 matmul operands in the kernel -> loosened tolerance vs f32 reference.
    ref = jax.nn.log_softmax((x @ w1 + b1) @ w2 + b2, axis=-1)
    assert out.shape == (batch, dim_out), f"bad shape {out.shape}"
    assert jnp.allclose(out, ref, atol=5e-2, rtol=5e-2), (
        f"mismatch vs reference: max|d|={jnp.max(jnp.abs(out - ref))}")

    print("KERNEL_OK")
</pallas_src>

<mosaic_0001>
module attributes {stable_mosaic.version = 11 : i64} {
  func.func @mlp_logsoftmax_kernel(%arg0: i32, %arg1: i32, %arg2: memref<8x32xbf16, #tpu.memory_space<vmem>>, %arg3: memref<32x128xbf16, #tpu.memory_space<vmem>>, %arg4: memref<1x128xf32, #tpu.memory_space<vmem>>, %arg5: memref<128x128xbf16, #tpu.memory_space<vmem>>, %arg6: memref<1x128xf32, #tpu.memory_space<vmem>>, %arg7: memref<8x128xf32, #tpu.memory_space<vmem>>, %arg8: memref<8x128xf32, #tpu.memory_space<vmem>>) attributes {dimension_semantics = [#tpu.dimension_semantics<parallel>, #tpu.dimension_semantics<arbitrary>], iteration_bounds = array<i64: 1, 1>, scalar_prefetch = 0 : i64, scratch_operands = 1 : i64, tpu.core_type = #tpu.core_type<tc>, window_params = [{transform_indices = @transform_0, window_bounds = array<i64: 8, 32>}, {transform_indices = @transform_1, window_bounds = array<i64: 32, 128>}, {transform_indices = @transform_2, window_bounds = array<i64: 1, 128>}, {transform_indices = @transform_3, window_bounds = array<i64: 128, 128>}, {pipeline_mode = #tpu.pipeline_mode<synchronous>, transform_indices = @transform_4, window_bounds = array<i64: 1, 128>}, {transform_indices = @transform_5, window_bounds = array<i64: 8, 128>}]} {
    %c0_i32 = arith.constant 0 : i32
    %0 = arith.cmpi eq, %arg1, %c0_i32 : i32
    %1 = arith.extui %0 : i1 to i32
    %c0_i32_0 = arith.constant 0 : i32
    %2 = arith.cmpi ne, %1, %c0_i32_0 : i32
    scf.if %2 {
      %c0_15 = arith.constant 0 : index
      %c0_16 = arith.constant 0 : index
      %18 = vector.load %arg6[%c0_15, %c0_16] : memref<1x128xf32, #tpu.memory_space<vmem>>, vector<1x128xf32>
      %19 = vector.shape_cast %18 : vector<1x128xf32> to vector<1x128xf32>
      %20 = vector.broadcast %19 : vector<1x128xf32> to vector<8x128xf32>
      %c0_17 = arith.constant 0 : index
      %c0_18 = arith.constant 0 : index
      %21 = vector.load %arg8[%c0_17, %c0_18] : memref<8x128xf32, #tpu.memory_space<vmem>>, vector<8x128xf32>
      tpu.vector_store %arg8[%c0_17, %c0_18], %20 {strides = array<i32>} : memref<8x128xf32, #tpu.memory_space<vmem>>, vector<8x128xf32>,
    } else {
    }
    %c0 = arith.constant 0 : index
    %c0_1 = arith.constant 0 : index
    %3 = vector.load %arg2[%c0, %c0_1] : memref<8x32xbf16, #tpu.memory_space<vmem>>, vector<8x32xbf16>
    %c0_2 = arith.constant 0 : index
    %c0_3 = arith.constant 0 : index
    %4 = vector.load %arg3[%c0_2, %c0_3] : memref<32x128xbf16, #tpu.memory_space<vmem>>, vector<32x128xbf16>
    %cst = arith.constant dense<0.000000e+00> : vector<8x128xf32>
    %5 = tpu.matmul %3, %4, %cst {dimension_numbers = #tpu.dot_dimension_numbers<[1], [0], [0], [1], [0, 0, 1, 1], [], []>} : vector<8x32xbf16>, vector<32x128xbf16>, vector<8x128xf32> -> vector<8x128xf32>
    %c0_4 = arith.constant 0 : index
    %c0_5 = arith.constant 0 : index
    %6 = vector.load %arg4[%c0_4, %c0_5] : memref<1x128xf32, #tpu.memory_space<vmem>>, vector<1x128xf32>
    %7 = vector.broadcast %6 : vector<1x128xf32> to vector<8x128xf32>
    %8 = arith.addf %5, %7 : vector<8x128xf32>
    %c0_6 = arith.constant 0 : index
    %c0_7 = arith.constant 0 : index
    %9 = vector.load %arg8[%c0_6, %c0_7] : memref<8x128xf32, #tpu.memory_space<vmem>>, vector<8x128xf32>
    %10 = arith.truncf %8 : vector<8x128xf32> to vector<8x128xbf16>
    %c0_8 = arith.constant 0 : index
    %c0_9 = arith.constant 0 : index
    %11 = vector.load %arg5[%c0_8, %c0_9] : memref<128x128xbf16, #tpu.memory_space<vmem>>, vector<128x128xbf16>
    %cst_10 = arith.constant dense<0.000000e+00> : vector<8x128xf32>
    %12 = tpu.matmul %10, %11, %cst_10 {dimension_numbers = #tpu.dot_dimension_numbers<[1], [0], [0], [1], [0, 0, 1, 1], [], []>} : vector<8x128xbf16>, vector<128x128xbf16>, vector<8x128xf32> -> vector<8x128xf32>
    %13 = arith.addf %9, %12 : vector<8x128xf32>
    %c0_11 = arith.constant 0 : index
    %c0_12 = arith.constant 0 : index
    %14 = vector.load %arg8[%c0_11, %c0_12] : memref<8x128xf32, #tpu.memory_space<vmem>>, vector<8x128xf32>
    tpu.vector_store %arg8[%c0_11, %c0_12], %13 {strides = array<i32>} : memref<8x128xf32, #tpu.memory_space<vmem>>, vector<8x128xf32>,
    %c0_i32_13 = arith.constant 0 : i32
    %15 = arith.cmpi eq, %arg1, %c0_i32_13 : i32
    %16 = arith.extui %15 : i1 to i32
    %c0_i32_14 = arith.constant 0 : i32
    %17 = arith.cmpi ne, %16, %c0_i32_14 : i32
    scf.if %17 {
      %c0_15 = arith.constant 0 : index
      %c0_16 = arith.constant 0 : index
      %18 = vector.load %arg8[%c0_15, %c0_16] : memref<8x128xf32, #tpu.memory_space<vmem>>, vector<8x128xf32>
      %cst_17 = arith.constant dense<0xFF800000> : vector<8xf32>
      %19 = vector.multi_reduction <maximumf>, %18, %cst_17 [1] : vector<8x128xf32> to vector<8xf32>
      %20 = vector.shape_cast %19 : vector<8xf32> to vector<8x1xf32>
      %21 = vector.broadcast %20 : vector<8x1xf32> to vector<8x128xf32>
      %22 = arith.subf %18, %21 : vector<8x128xf32>
      %23 = math.exp %22 : vector<8x128xf32>
      %cst_18 = arith.constant dense<0.000000e+00> : vector<8xf32>
      %24 = vector.multi_reduction <add>, %23, %cst_18 [1] : vector<8x128xf32> to vector<8xf32>
      %25 = vector.shape_cast %24 : vector<8xf32> to vector<8x1xf32>
      %26 = math.log %25 : vector<8x1xf32>
      %27 = vector.broadcast %26 : vector<8x1xf32> to vector<8x128xf32>
      %28 = arith.subf %22, %27 : vector<8x128xf32>
      %c0_19 = arith.constant 0 : index
      %c0_20 = arith.constant 0 : index
      %29 = vector.load %arg7[%c0_19, %c0_20] : memref<8x128xf32, #tpu.memory_space<vmem>>, vector<8x128xf32>
      tpu.vector_store %arg7[%c0_19, %c0_20], %28 {strides = array<i32>} : memref<8x128xf32, #tpu.memory_space<vmem>>, vector<8x128xf32>,
    } else {
    }
    return
  }
  func.func @transform_0(%arg0: i32, %arg1: i32) -> (i32, i32) {
    %c0_i32 = arith.constant 0 : i32
    %c0_i32_0 = arith.constant 0 : i32
    return %arg0, %c0_i32 : i32, i32
  }
  func.func @transform_1(%arg0: i32, %arg1: i32) -> (i32, i32) {
    %c0_i32 = arith.constant 0 : i32
    %c0_i32_0 = arith.constant 0 : i32
    return %c0_i32, %arg1 : i32, i32
  }
  func.func @transform_2(%arg0: i32, %arg1: i32) -> (i32, i32) {
    %c0_i32 = arith.constant 0 : i32
    %c0_i32_0 = arith.constant 0 : i32
    return %c0_i32, %arg1 : i32, i32
  }
  func.func @transform_3(%arg0: i32, %arg1: i32) -> (i32, i32) {
    %c0_i32 = arith.constant 0 : i32
    %c0_i32_0 = arith.constant 0 : i32
    return %arg1, %c0_i32 : i32, i32
  }
  func.func @transform_4(%arg0: i32, %arg1: i32) -> (i32, i32) {
    %c0_i32 = arith.constant 0 : i32
    %c0_i32_0 = arith.constant 0 : i32
    %c0_i32_1 = arith.constant 0 : i32
    return %c0_i32, %c0_i32_0 : i32, i32
  }
  func.func @transform_5(%arg0: i32, %arg1: i32) -> (i32, i32) {
    %c0_i32 = arith.constant 0 : i32
    %c0_i32_0 = arith.constant 0 : i32
    return %arg0, %c0_i32 : i32, i32
  }
}

</mosaic_0001>

<bundles_post_ra>
// kernel: tpu_custom_call.1
= control target key start
LH: loop header
LB: loop body
LE: loop exit
PB: predicated region body
PF: predicated region fallthrough
CT: control target
= control target key end

     0   :  { %10 = vsyncpa [#allocation4], 0  ;;  %s497_s0 = inlined_call_operand.hbm [shape: bf16[8,32], index: 0, kind: input, shape index: {}]   ;;  %s498_s1 = inlined_call_operand.hbm [shape: bf16[32,128], index: 1, kind: input, shape index: {}]   ;;  %s499_s2 = inlined_call_operand.vmem [shape: f32[1,128], index: 2, kind: input, shape index: {}]   ;;  %s500_s3 = inlined_call_operand.hbm [shape: bf16[128,128], index: 3, kind: input, shape index: {}]   ;;  %s501_s4 = inlined_call_operand.vmem [shape: f32[1,128], index: 4, kind: input, shape index: {}]   ;;  %s502_s5 = inlined_call_operand.hbm [shape: f32[8,128], index: 5, kind: output, shape index: {}]  }
   0x1   :  { %11 = vsyncpa [#allocation7], 0 }
   0x2   :  { %12 = vsyncpa [#allocation5], 0  ;;  %s441_s18 = smov [#allocation6]  }
   0x3   :  { %s28_s19 = sshll.u32 %s441_s18, 4  ;;  %s29_s19 = int_to_ptr.vmem [resolvable:$true] %s28_s19 }
   0x4   :  { %s363_s20 = scalar_lea.vmem %s29_s19, 256  ;;  %p368_p1 = scmp.lt.s32.totalorder %s29_s19, %s29_s19 }
   0x5   :  { %p364_p0 = scmp.ne.s32.totalorder %s29_s19, %s363_s20  ;;  %p369_p2 = scmp.lt.s32.totalorder %s363_s20, %s363_s20 }
   0x7   :  { %p370_p3 = por %p369_p2, %p368_p1 }
   0x9   :  { %p371_p4 = pnand %p370_p3, %p364_p0 }
   0xb   :  { %374 = shalt.err (!%p371_p4)
}
   0xc   :  { %s442_s21 = smov 64   ;;  %s443_s22 = smov 4  }
   0xd   :  { %34 = dma.hbm_to_vmem [thread:$0]  %s498_s1, 256, %s29_s19, [#allocation7], %s442_s21, %s442_s21, %s443_s22  }
   0xe   :  { %s444_s25 = smov [#allocation3]   ;;  %s445_s27 = smov [#allocation8]  }
   0xf   :  { %s19_s26 = sshll.u32 %s444_s25, 4  ;;  %s42_s28 = sshll.u32 %s445_s27, 4  ;;  %s20_s26 = int_to_ptr.vmem [resolvable:$true] %s19_s26  ;;  %s43_s28 = int_to_ptr.vmem [resolvable:$true] %s42_s28 }
  0x10   :  { %s383_s29 = scalar_lea.vmem %s20_s26, 64  ;;  %p388_p6 = scmp.lt.s32.totalorder %s20_s26, %s20_s26 }
  0x11   :  { %p384_p5 = scmp.ne.s32.totalorder %s20_s26, %s383_s29  ;;  %p389_p7 = scmp.lt.s32.totalorder %s383_s29, %s383_s29 }
  0x13   :  { %p390_p8 = por %p389_p7, %p388_p6 }
  0x15   :  { %p391_p9 = pnand %p390_p8, %p384_p5 }
  0x17   :  { %394 = shalt.err (!%p391_p9)
}
  0x18   :  { %22 = dma.hbm_to_vmem [thread:$0]  %s497_s0, 64, %s20_s26, [#allocation4]  }
  0x19   :  { %s403_s7 = scalar_lea.vmem %s43_s28, 1024  ;;  %p408_p11 = scmp.lt.s32.totalorder %s43_s28, %s43_s28 }
  0x1a   :  { %p404_p10 = scmp.ne.s32.totalorder %s43_s28, %s403_s7  ;;  %p409_p12 = scmp.lt.s32.totalorder %s403_s7, %s403_s7 }
  0x1c   :  { %p410_p13 = por %p409_p12, %p408_p11 }
  0x1e   :  { %p411_p0 = pnand %p410_p13, %p404_p10 }
  0x20   :  { %414 = shalt.err (!%p411_p0)
}
  0x21   :  { %48 = dma.hbm_to_vmem [thread:$0]  %s500_s3, 1024, %s43_s28, [#allocation7], %s442_s21, %s442_s21, %s443_s22  }
  0x22   :  { %435 = dma.done.wait [#allocation4], 64  }
  0x23   :  { %436 = vsyncadd [#allocation4], 4294967232 }
  0x24   :  { %437 = dma.done.wait [#allocation7], 1280  }
  0x25   :  { %438 = vsyncadd [#allocation7], 4294966016  ;;  %v446_v0 = vmov 0.0   ;;  %vm447_vm0 = vmmov 0   ;;  %v341_v1 = vld [vmem:[#allocation6 + $0x8] sm:$0xff]   ;;  %v342_v2 = vld [vmem:[#allocation6] sm:$0xff]  }
  0x26   :  { %305 = vmatprep.subr.bf16.mxu0 %v446_v0  ;;  %309 = vmatprep.mubr.msk.bf16.mxu0 %vm447_vm0, %v446_v0  ;;  %v343_v3 = vld [vmem:[#allocation8 + $0x38] sm:$0xff]   ;;  %vm97_vm1 = vcmask 261120   ;;  %v344_v4 = vld [vmem:[#allocation8 + $0x30] sm:$0xff]   ;;  %v73_v5 = vld [vmem:[#allocation3] sm:$0xf] }
  0x27   :  { %313 = vmatprep.subr.bf16.mxu1 %v446_v0  ;;  %329 = vmatprep.mubr.msk.bf16.mxu1 %vm447_vm0, %v446_v0  ;;  %v345_v6 = vld [vmem:[#allocation8 + $0x28] sm:$0xff]   ;;  %v346_v7 = vld [vmem:[#allocation8 + $0x20] sm:$0xff]   ;;  %v347_v8 = vld [vmem:[#allocation8 + $0x18] sm:$0xff]  }
  0x28   :  { %306 = vmatpush3.bf16.msra.mxu0 %v341_v1  ;;  %314 = vmatpush3.bf16.msra.mxu1 %v343_v3  ;;  %v348_v9 = vld [vmem:[#allocation8 + $0x10] sm:$0xff]   ;;  %v349_v10 = vld [vmem:[#allocation8 + $0x8] sm:$0xff]   ;;  %v350_v11 = vld [vmem:[#allocation8] sm:$0xff]  }
  0x29   :  { %307 = vmatprep.subr.bf16.mxu0 %v446_v0  ;;  %315 = vmatprep.subr.bf16.mxu1 %v446_v0  ;;  %v281_v12 = vld [vmem:[%s499_s2] ss:$0 sm:$0xff]  ;;  %s448_s2 = smov [#allocation9]  }
  0x2a   :  { %v280_v19 = vld [vmem:[%s501_s4] ss:$0 sm:$0xff]  ;;  %s270_s11 = sshll.u32 %s448_s2, 4  ;;  %s271_s11 = int_to_ptr.vmem [resolvable:$true] %s270_s11 }
  0x2b   :  { %s415_s4 = scalar_lea.vmem %s271_s11, 128  ;;  %p420_p2 = scmp.lt.s32.totalorder %s271_s11, %s271_s11 }
  0x2c   :  { %308 = vmatpush3.bf16.msra.mxu0 %v342_v2  ;;  %316 = vmatpush3.bf16.msra.mxu1 %v344_v4  ;;  %p416_p1 = scmp.ne.s32.totalorder %s271_s11, %s415_s4  ;;  %p421_p3 = scmp.lt.s32.totalorder %s415_s4, %s415_s4 }
  0x2d   :  { %317 = vmatprep.subr.bf16.mxu1 %v446_v0 }
  0x2e   :  { %p422_p4 = por %p421_p3, %p420_p2 }
  0x2f   :  { %310 = vmatmul.mubr.msk.bf16.vlgmr.msra.gmra.mxu0 %vm97_vm1, %v73_v5 }
  0x30   :  { %318 = vmatpush3.bf16.msra.mxu1 %v345_v6  ;;  %p423_p5 = pnand %p422_p4, %p416_p1 }
  0x31   :  { %319 = vmatprep.subr.bf16.mxu1 %v446_v0 }
  0x34   :  { %320 = vmatpush3.bf16.msra.mxu1 %v346_v7 }
  0x35   :  { %321 = vmatprep.subr.bf16.mxu1 %v446_v0 }
  0x38   :  { %322 = vmatpush3.bf16.msra.mxu1 %v347_v8 }
  0x39   :  { %323 = vmatprep.subr.bf16.mxu1 %v446_v0 }
  0x3c   :  { %324 = vmatpush3.bf16.msra.mxu1 %v348_v9 }
  0x3d   :  { %325 = vmatprep.subr.bf16.mxu1 %v446_v0 }
  0x40   :  { %326 = vmatpush3.bf16.msra.mxu1 %v349_v10 }
  0x41   :  { %327 = vmatprep.subr.bf16.mxu1 %v446_v0 }
  0x44   :  { %328 = vmatpush3.bf16.msra.mxu1 %v350_v11 }
  0xef   :  { %v135_v13 = vpop.f32.mrf.mxu0 }
  0xf0   :  { %v136_v14 = vadd.f32 %v281_v12, %v135_v13 }
  0xf1   :  { %v311_v15 = vpop.f32.mrf.mxu0 }
  0xf2   :  { %v142_v16 = vpack.c.bf16 %v136_v14, %v136_v14 }
  0xf3   :  { %v138_v17 = vpop.f32.mrf.mxu0 }
  0xf4   :  { %330 = vmatmul.mubr.bf16.vlgmr.msra.gmra.mxu1 %v142_v16 }
  0xf5   :  { %v312_v18 = vpop.f32.mrf.mxu0 }
 0x1b4   :  { %v241_v20 = vpop.f32.mrf.mxu1 }
 0x1b5   :  { %v247_v21 = vadd.f32 %v280_v19, %v241_v20 }
 0x1b6   :  { %v331_v22 = vpop.f32.mrf.mxu1 }
 0x1b7   :  { %253 = vmax.xlane.f32.xlu0 %v247_v21 }
 0x1b8   :  { %v244_v23 = vpop.f32.mrf.mxu1 }
 0x1ba   :  { %v332_v24 = vpop.f32.mrf.mxu1 }
 0x240   :  { %v254_v25 = vpop.xlane.xlu0 %253 }
 0x241   :  { %v255_v26 = vsub.f32 %v247_v21, %v254_v25 }
 0x243   :  { %v256_v27 = vmul.f32 1.442695, %v255_v26 }
 0x245   :  { %351 = vpow2.f32 %v256_v27 }
 0x252   :  { %v352_v28 = vpop.eup %351 }
 0x253   :  { %258 = vadd.xlane.f32.xlu0 %v352_v28 }
 0x2dc   :  { %v259_v29 = vpop.xlane.xlu0 %258 }
 0x2dd   :  { %353 = vlog2.f32 %v259_v29 }
 0x2ea   :  { %v354_v30 = vpop.eup %353 }
 0x2eb   :  { %v261_v31 = vmul.f32 0.6931472, %v354_v30 }
 0x2ed   :  { %v262_v32 = vsub.f32 %v255_v26, %v261_v31 }
 0x2ef   :  { %263 = vst [vmem:[#allocation9] sm:$0xff] %v262_v32 }
 0x2f0   :  { %426 = shalt.err (!%p423_p5)
}
 0x2f1   :  { %273 = dma.vmem_to_hbm [thread:$0]  %s271_s11, 128, %s502_s5, [#allocation5]  }
 0x2f2   :  { %439 = dma.done.wait [#allocation5], 128  }
 0x2f3   :  { %440 = vsyncadd [#allocation5], 4294967168 }
 0x2f4   :  { %277 = vsyncpa [#allocation4], 1 }
 0x2f5   :  { %278 = vsyncpa [#allocation7], 1 }
 0x2f6   :  { %279 = vsyncpa [#allocation5], 1 }

</bundles_post_ra>
